<compile_context>
chip_gen: v5e
topology: v5e:2x2
jax: 0.10.0
libtpu: 0.0.40
codegen_flags: <defaults>
</compile_context>

<pallas_src>
import functools

import jax
import jax.numpy as jnp
from jax.experimental import pallas as pl
from jax.experimental.pallas import tpu as pltpu

_LANE = 128          # lane width (last dim)
_SUBLANE = 16        # use the stricter bf16 sublane so bf16 output tiles are always legal
_MAX_TILE_B = 4096   # per-step batch tile cap
_MIN_GRID_STEPS = 4  # keep >=4 grid steps at large B: pipelining + both v7x TensorCores


def _round_up(n, m):
    return ((n + m - 1) // m) * m


def _pick_batch_tile(B, max_tile_b=_MAX_TILE_B, min_steps=_MIN_GRID_STEPS):
    """Core-aware batch tile.

    Tiny B -> single full-extent block (overhead-dominated anyway).
    Large B -> multiple of 16 chosen so the grid has >= min_steps steps.
    """
    if B <= _SUBLANE * min_steps:
        return B
    tb = _round_up(-(-B // min_steps), _SUBLANE)   # ceil(B/min_steps) rounded to 16
    return max(_SUBLANE, min(tb, max_tile_b))


def _linear_kernel(x_ref, wt_ref, b_ref, o_ref):
    # x_ref:  (TB, D_in)        VMEM  (batch tile, streamed over grid)
    # wt_ref: (D_in, D_out_pad) VMEM  (W^T, zero-padded lanes; resident)
    # b_ref:  (1, D_out_pad)    VMEM  (bias row, zero-padded; resident)
    # o_ref:  (TB, D_out_pad)   VMEM  (lane-dense output tile; f32 or bf16)
    acc = jnp.dot(x_ref[...], wt_ref[...], preferred_element_type=jnp.float32)
    o_ref[...] = (acc + b_ref[...]).astype(o_ref.dtype)


def prepare_params(weight, bias):
    """One-time parameter prep (init-path, NOT per forward call).

    weight: (D_out, D_in) PyTorch nn.Linear convention; bias: (D_out,).
    Returns W^T zero-padded to (D_in, D_out_pad) and bias as (1, D_out_pad),
    with D_out_pad a multiple of 128 so the kernel output is lane-dense.
    """
    D_out, D_in = weight.shape
    d_out_pad = _round_up(D_out, _LANE)
    wt_pad = jnp.zeros((D_in, d_out_pad), weight.dtype).at[:, :D_out].set(weight.T)
    b_pad = jnp.zeros((1, d_out_pad), bias.dtype).at[0, :D_out].set(bias)
    return wt_pad, b_pad


def _linear_padded(x, wt_pad, b_pad, *, tb, out_dtype):
    B, D_in = x.shape
    d_out_pad = wt_pad.shape[1]
    return pl.pallas_call(
        _linear_kernel,
        out_shape=jax.ShapeDtypeStruct((B, d_out_pad), out_dtype),
        grid_spec=pl.GridSpec(
            # Ragged last block allowed: out-of-bounds output rows are dropped,
            # and the wrapper never exposes rows >= B anyway.
            grid=(pl.cdiv(B, tb),),
            in_specs=[
                pl.BlockSpec((tb, D_in), lambda i: (i, 0)),         # stream x over batch
                pl.BlockSpec((D_in, d_out_pad), lambda i: (0, 0)),  # W^T resident
                pl.BlockSpec((1, d_out_pad), lambda i: (0, 0)),     # bias resident
            ],
            out_specs=pl.BlockSpec((tb, d_out_pad), lambda i: (i, 0)),
        ),
        compiler_params=pltpu.CompilerParams(
            # batch axis is independent -> double-buffered DMAs and, on v7x,
            # sharding across both TensorCores.
            dimension_semantics=("parallel",)),
    )(x, wt_pad, b_pad)


@functools.partial(jax.jit, static_argnames=("d_out", "out_dtype"))
def basic_head_forward(x, wt_pad, b_pad, *, d_out, out_dtype=jnp.float32):
    """x: (B, D_in) f32; wt_pad/b_pad from prepare_params; d_out: true output width.

    Whole forward (pallas_call + final lane slice) is one jit dispatch, so the
    slice fuses and no extra HBM pass / launch is paid.
    """
    out_pad = _linear_padded(x, wt_pad, b_pad, tb=_pick_batch_tile(x.shape[0]),
                             out_dtype=out_dtype)
    return out_pad[:, :d_out]


if __name__ == "__main__":
    # Small shapes consistent with the module: features flattened to D_in, D_out=4 rotations.
    B, D_in, D_out = 8, 32, 4

    key = jax.random.PRNGKey(0)
    kx, kw, kb = jax.random.split(key, 3)

    # Deterministic init matching torch.nn.Linear: U(-1/sqrt(D_in), 1/sqrt(D_in))
    bound = 1.0 / (D_in ** 0.5)
    x = jax.random.normal(kx, (B, D_in), dtype=jnp.float32)
    weight = jax.random.uniform(kw, (D_out, D_in), jnp.float32, -bound, bound)
    bias = jax.random.uniform(kb, (D_out,), jnp.float32, -bound, bound)

    # One-time parameter preparation (init-path), kept out of the forward call.
    wt_pad, b_pad = prepare_params(weight, bias)

    # f32 output (exact nn.Linear semantics), tiny-batch single-block path.
    out = jax.block_until_ready(basic_head_forward(x, wt_pad, b_pad, d_out=D_out))
    ref = x @ weight.T + bias
    assert out.shape == (B, D_out)
    assert jnp.allclose(out, ref, atol=1e-5, rtol=1e-5), float(jnp.max(jnp.abs(out - ref)))

    # Larger-batch path: core-aware multi-step grid, ragged last block (cdiv),
    # bf16 output stream (halved writeback traffic).
    B2 = 200
    x2 = jax.random.normal(jax.random.PRNGKey(1), (B2, D_in), dtype=jnp.float32)
    out2 = jax.block_until_ready(
        basic_head_forward(x2, wt_pad, b_pad, d_out=D_out, out_dtype=jnp.bfloat16))
    ref2 = x2 @ weight.T + bias
    assert out2.shape == (B2, D_out)
    assert jnp.allclose(out2.astype(jnp.float32), ref2, atol=3e-2, rtol=3e-2), \
        float(jnp.max(jnp.abs(out2.astype(jnp.float32) - ref2)))

    print("KERNEL_OK")
</pallas_src>

<mosaic_0001>
module attributes {stable_mosaic.version = 11 : i64} {
  func.func @_linear_kernel(%arg0: i32, %arg1: memref<8x32xf32, #tpu.memory_space<vmem>>, %arg2: memref<32x128xf32, #tpu.memory_space<vmem>>, %arg3: memref<1x128xf32, #tpu.memory_space<vmem>>, %arg4: memref<8x128xf32, #tpu.memory_space<vmem>>) attributes {dimension_semantics = [#tpu.dimension_semantics<parallel>], iteration_bounds = array<i64: 1>, scalar_prefetch = 0 : i64, scratch_operands = 0 : i64, tpu.core_type = #tpu.core_type<tc>, window_params = [{transform_indices = @transform_0, window_bounds = array<i64: 8, 32>}, {pipeline_mode = #tpu.pipeline_mode<synchronous>, transform_indices = @transform_1, window_bounds = array<i64: 32, 128>}, {pipeline_mode = #tpu.pipeline_mode<synchronous>, transform_indices = @transform_2, window_bounds = array<i64: 1, 128>}, {transform_indices = @transform_3, window_bounds = array<i64: 8, 128>}]} {
    %c0 = arith.constant 0 : index
    %c0_0 = arith.constant 0 : index
    %0 = vector.load %arg1[%c0, %c0_0] : memref<8x32xf32, #tpu.memory_space<vmem>>, vector<8x32xf32>
    %c0_1 = arith.constant 0 : index
    %c0_2 = arith.constant 0 : index
    %1 = vector.load %arg2[%c0_1, %c0_2] : memref<32x128xf32, #tpu.memory_space<vmem>>, vector<32x128xf32>
    %cst = arith.constant dense<0.000000e+00> : vector<8x128xf32>
    %2 = tpu.matmul %0, %1, %cst {dimension_numbers = #tpu.dot_dimension_numbers<[1], [0], [0], [1], [0, 0, 1, 1], [], []>} : vector<8x32xf32>, vector<32x128xf32>, vector<8x128xf32> -> vector<8x128xf32>
    %c0_3 = arith.constant 0 : index
    %c0_4 = arith.constant 0 : index
    %3 = vector.load %arg3[%c0_3, %c0_4] : memref<1x128xf32, #tpu.memory_space<vmem>>, vector<1x128xf32>
    %4 = vector.broadcast %3 : vector<1x128xf32> to vector<8x128xf32>
    %5 = arith.addf %2, %4 : vector<8x128xf32>
    %c0_5 = arith.constant 0 : index
    %c0_6 = arith.constant 0 : index
    %6 = vector.load %arg4[%c0_5, %c0_6] : memref<8x128xf32, #tpu.memory_space<vmem>>, vector<8x128xf32>
    tpu.vector_store %arg4[%c0_5, %c0_6], %5 {strides = array<i32>} : memref<8x128xf32, #tpu.memory_space<vmem>>, vector<8x128xf32>,
    return
  }
  func.func @transform_0(%arg0: i32) -> (i32, i32) {
    %c0_i32 = arith.constant 0 : i32
    %c0_i32_0 = arith.constant 0 : i32
    return %arg0, %c0_i32 : i32, i32
  }
  func.func @transform_1(%arg0: i32) -> (i32, i32) {
    %c0_i32 = arith.constant 0 : i32
    %c0_i32_0 = arith.constant 0 : i32
    %c0_i32_1 = arith.constant 0 : i32
    return %c0_i32, %c0_i32_0 : i32, i32
  }
  func.func @transform_2(%arg0: i32) -> (i32, i32) {
    %c0_i32 = arith.constant 0 : i32
    %c0_i32_0 = arith.constant 0 : i32
    %c0_i32_1 = arith.constant 0 : i32
    return %c0_i32, %c0_i32_0 : i32, i32
  }
  func.func @transform_3(%arg0: i32) -> (i32, i32) {
    %c0_i32 = arith.constant 0 : i32
    %c0_i32_0 = arith.constant 0 : i32
    return %arg0, %c0_i32 : i32, i32
  }
}

</mosaic_0001>

<bundles_post_ra>
// kernel: basic_head_forward.1
= control target key start
LH: loop header
LB: loop body
LE: loop exit
PB: predicated region body
PF: predicated region fallthrough
CT: control target
= control target key end

     0   :  { %8 = vsyncpa [#allocation3], 0  ;;  %s178_s0 = inlined_call_operand.hbm [shape: f32[8,32], index: 0, kind: input, shape index: {}]   ;;  %s179_s1 = inlined_call_operand.hbm [shape: f32[32,128], index: 1, kind: input, shape index: {}]   ;;  %s180_s2 = inlined_call_operand.vmem [shape: f32[1,128], index: 2, kind: input, shape index: {}]   ;;  %s181_s3 = inlined_call_operand.vmem [shape: f32[8,128], index: 3, kind: output, shape index: {}]  }
   0x1   :  { %s15_s14 = sshll.u32 %s178_s0, 4  ;;  %s16_s14 = int_to_ptr.hbm [resolvable:$true] %s15_s14 }
   0x2   :  { %9 = vsyncpa [#allocation5], 0  ;;  %s142_s15 = smov [#allocation2]   ;;  %s25_s19 = sshll.u32 %s179_s1, 4  ;;  %s26_s19 = int_to_ptr.hbm [resolvable:$true] %s25_s19 }
   0x3   :  { %s17_s16 = sshll.u32 %s142_s15, 4  ;;  %s143_s20 = smov [#allocation4]   ;;  %s18_s16 = int_to_ptr.vmem [resolvable:$true] %s17_s16 }
   0x4   :  { %20 = dma.hbm_to_vmem [thread:$0]  %s16_s14, 128, %s18_s16, [#allocation3]  }
   0x5   :  { %s27_s21 = sshll.u32 %s143_s20, 4  ;;  %s144_s22 = smov 128   ;;  %s28_s21 = int_to_ptr.vmem [resolvable:$true] %s27_s21 }
   0x6   :  { %s145_s23 = smov 8  }
   0x7   :  { %33 = dma.hbm_to_vmem [thread:$0]  %s26_s19, 512, %s28_s21, [#allocation5], %s144_s22, %s144_s22, %s145_s23  }
   0x8   :  { %138 = dma.done.wait [#allocation3], 128  }
   0x9   :  { %139 = vsyncadd [#allocation3], 4294967168 }
   0xa   :  { %140 = dma.done.wait [#allocation5], 512  }
   0xb   :  { %141 = vsyncadd [#allocation5], 4294966784  ;;  %v48_v0 = vld [vmem:[#allocation4 + $0x18] sm:$0xff]  ;;  %v47_v1 = vld [vmem:[#allocation4 + $0x10] sm:$0xff]  ;;  %vm53_vm0 = vcmask 261120  }
   0xc   :  { %69 = vmatpush.msra.mxu0 %v48_v0  ;;  %v46_v2 = vld [vmem:[#allocation4 + $0x8] sm:$0xff]  ;;  %v45_v3 = vld [vmem:[#allocation4] sm:$0xff]  ;;  %v44_v4 = vld [vmem:[#allocation2] sm:$0xff] }
   0xd   :  { %v89_v5 = vld [vmem:[%s180_s2] ss:$0 sm:$0xff] }
   0xe   :  { %70 = vmatpush.msra.mxu0 %v47_v1 }
  0x10   :  { %71 = vmatpush.msra.mxu0 %v46_v2 }
  0x12   :  { %72 = vmatpush.msra.mxu0 %v45_v3 }
  0x13   :  { %84 = vmatmul.msk.f32.vlgmr.msra.gmra.mxu0 %vm53_vm0, %v44_v4 }
  0x90   :  { %v74_v6 = vpop.f32.mrf.mxu0 }
  0x91   :  { %v75_v7 = vadd.f32 %v89_v5, %v74_v6 }
  0x93   :  { %77 = vst [vmem:[%s181_s3] sm:$0xff] %v75_v7 }
  0x94   :  { %82 = vsyncpa [#allocation3], 1 }
  0x95   :  { %83 = vsyncpa [#allocation5], 1 }

</bundles_post_ra>
